<compile_context>
chip_gen: v6e
topology: v6e:2x2x1
jax: 0.10.0
libtpu: 0.0.40
codegen_flags: <defaults>
</compile_context>

<pallas_src>
import functools

import jax
import jax.numpy as jnp
from jax.experimental import pallas as pl
from jax.experimental.pallas import tpu as pltpu


# ---------------------------------------------------------------------------
# small helpers
# ---------------------------------------------------------------------------
def _pick_tile(n, candidates):
    """Largest candidate tile that divides n, else the full extent."""
    for c in candidates:
        if n % c == 0:
            return c
    return n


def _vmem_limit(*nbytes):
    """Scoped-VMEM budget from actual block sizes, with headroom."""
    total = int(1.5 * sum(int(b) for b in nbytes)) + (2 << 20)
    return int(min(max(total, 16 << 20), 100 << 20))


# ---------------------------------------------------------------------------
# Pallas kernel 1: shared MLP (1x1 conv, folded BN, ReLU) + max-pool over the
# nsample axis.  Grid = (batch, npoint tiles), both parallel.
# ---------------------------------------------------------------------------
def _mlp_maxpool_kernel(g_ref, w1_ref, b1_ref, w2_ref, b2_ref, o_ref):
    nsample = g_ref.shape[1]
    acc = None
    for s in range(nsample):                       # static, fully unrolled
        x = g_ref[0, s]                            # (cin, tile_np)
        h = jnp.dot(w1_ref[...], x, preferred_element_type=jnp.float32)
        h = jnp.maximum(h + b1_ref[...], 0.0)      # (h1, tile_np)
        h = jnp.dot(w2_ref[...], h.astype(w2_ref.dtype),
                    preferred_element_type=jnp.float32)
        h = jnp.maximum(h + b2_ref[...], 0.0)      # (cout, tile_np)
        acc = h if acc is None else jnp.maximum(acc, h)   # max-pool in registers
    o_ref[0] = acc


def mlp_maxpool(grouped, w1, b1, w2, b2, *, compute_dtype=jnp.bfloat16):
    """grouped: (B, nsample, cin, npoint) -> (B, cout, npoint) float32."""
    B, ns, cin, npoint = grouped.shape
    h1 = w1.shape[0]
    cout = w2.shape[0]
    tile_np = _pick_tile(npoint, (512, 384, 256, 128))

    grouped = grouped.astype(compute_dtype)        # halves the dominant HBM stream
    w1 = w1.astype(compute_dtype)
    w2 = w2.astype(compute_dtype)
    b1 = b1.astype(jnp.float32)
    b2 = b2.astype(jnp.float32)

    csz = jnp.dtype(compute_dtype).itemsize
    vmem = _vmem_limit(
        2 * ns * cin * tile_np * csz,                       # double-buffered grouped tile
        2 * cout * tile_np * 4,                             # double-buffered output tile
        (h1 * cin + cout * h1) * csz + (h1 + cout) * 4,     # weights/biases
        (cin + h1 + 2 * cout) * tile_np * 4)                # live values / spill margin

    return pl.pallas_call(
        _mlp_maxpool_kernel,
        out_shape=jax.ShapeDtypeStruct((B, cout, npoint), jnp.float32),
        grid=(B, npoint // tile_np),
        in_specs=[
            pl.BlockSpec((1, ns, cin, tile_np), lambda b, p: (b, 0, 0, p)),
            pl.BlockSpec((h1, cin), lambda b, p: (0, 0)),
            pl.BlockSpec((h1, 1), lambda b, p: (0, 0)),
            pl.BlockSpec((cout, h1), lambda b, p: (0, 0)),
            pl.BlockSpec((cout, 1), lambda b, p: (0, 0)),
        ],
        out_specs=pl.BlockSpec((1, cout, tile_np), lambda b, p: (b, 0, p)),
        compiler_params=pltpu.CompilerParams(
            dimension_semantics=("parallel", "parallel"),
            vmem_limit_bytes=vmem),
    )(grouped, w1, b1, w2, b2)


# ---------------------------------------------------------------------------
# Pallas kernel 2: SA layer (PCT offset-attention, tied q/k conv, BatchNorm1d
# folded into trans_conv, residual + ReLU), query-dimension tiled.
#   softmax is over the key axis (complete within one query tile); the
#   /column-sum normalization and the x_v @ attention contraction both sum
#   over queries, so they are accumulated in VMEM scratch across tiles and the
#   column-sum division is applied after the contraction (mathematically
#   identical to the torch module).
# ---------------------------------------------------------------------------
def _sa_layer_kernel(xf_ref, xt_ref, wqk_ref, wv_ref, bv_ref, wt_ref, bt_ref,
                     o_ref, k_sc, xr_sc, cs_sc, *, recip_approx):
    qi = pl.program_id(1)
    nq = pl.num_programs(1)
    cd = k_sc.dtype

    @pl.when(qi == 0)
    def _():
        # tied q/k conv: keys for the whole point set, computed once per batch
        xc_full = xf_ref[0].astype(cd)                                 # (C, N)
        k_sc[...] = jnp.dot(wqk_ref[...], xc_full,
                            preferred_element_type=jnp.float32).astype(cd)
        xr_sc[...] = jnp.zeros_like(xr_sc)
        cs_sc[...] = jnp.zeros_like(cs_sc)

    xc = xt_ref[0].astype(cd)                                          # (C, tq)
    q = jnp.dot(wqk_ref[...], xc, preferred_element_type=jnp.float32)  # (C4, tq)
    # energy[i, j] = sum_d q[d, i] * k[d, j]   -> (tq, N)
    energy = jax.lax.dot_general(q.astype(cd), k_sc[...],
                                 (((0,), (0,)), ((), ())),
                                 preferred_element_type=jnp.float32)
    e = jnp.exp(energy - jnp.max(energy, axis=-1, keepdims=True))
    att = e * pl.reciprocal(jnp.sum(e, axis=-1, keepdims=True),
                            approx=recip_approx)                       # softmax(dim=-1)
    cs_sc[...] += jnp.sum(att, axis=0, keepdims=True)                  # column sums (torch dim=1)

    xv = jnp.dot(wv_ref[...], xc, preferred_element_type=jnp.float32) + bv_ref[...]
    xr_sc[...] += jnp.dot(xv.astype(cd), att.astype(cd),
                          preferred_element_type=jnp.float32)          # (C, N)

    @pl.when(qi == nq - 1)
    def _():
        x_full = xf_ref[0]                                             # (C, N) f32
        # attention / (1e-9 + colsum) commutes with the contraction above
        xr = xr_sc[...] * pl.reciprocal(1e-9 + cs_sc[...], approx=recip_approx)
        t = jnp.dot(wt_ref[...], (x_full - xr).astype(wt_ref.dtype),
                    preferred_element_type=jnp.float32) + bt_ref[...]  # trans_conv + folded BN
        o_ref[0] = x_full + jnp.maximum(t, 0.0)


def sa_layer(x, wqk, wv, bv, wt, bt, *, compute_dtype=jnp.bfloat16,
             recip_approx=True):
    """x: (B, C, npoint) float32 -> (B, C, npoint) float32."""
    B, c, n = x.shape
    c4 = wqk.shape[0]
    tq = _pick_tile(n, (256, 128))     # 128-multiples keep v5e's 4x128 MXU happy
    nq = n // tq

    x = x.astype(jnp.float32)
    wqk = wqk.astype(compute_dtype)
    wv = wv.astype(compute_dtype)
    wt = wt.astype(compute_dtype)
    bv = bv.astype(jnp.float32)
    bt = bt.astype(jnp.float32)

    csz = jnp.dtype(compute_dtype).itemsize
    vmem = _vmem_limit(
        2 * c * n * 4,                                  # resident x_full block
        2 * c * tq * 4,                                 # double-buffered query tile
        2 * c * n * 4,                                  # resident output block
        (c4 * c + 2 * c * c) * csz + 2 * c * 4,         # weights/biases
        c4 * n * csz + c * n * 4 + n * 4,               # k / xr / colsum scratch
        3 * tq * n * 4)                                 # energy / exp / att live values

    kernel = functools.partial(_sa_layer_kernel, recip_approx=recip_approx)
    return pl.pallas_call(
        kernel,
        out_shape=jax.ShapeDtypeStruct((B, c, n), jnp.float32),
        grid=(B, nq),
        in_specs=[
            pl.BlockSpec((1, c, n), lambda b, q: (b, 0, 0)),    # x (resident)
            pl.BlockSpec((1, c, tq), lambda b, q: (b, 0, q)),   # x query tile
            pl.BlockSpec((c4, c), lambda b, q: (0, 0)),
            pl.BlockSpec((c, c), lambda b, q: (0, 0)),
            pl.BlockSpec((c, 1), lambda b, q: (0, 0)),
            pl.BlockSpec((c, c), lambda b, q: (0, 0)),
            pl.BlockSpec((c, 1), lambda b, q: (0, 0)),
        ],
        out_specs=pl.BlockSpec((1, c, n), lambda b, q: (b, 0, 0)),
        scratch_shapes=[
            pltpu.VMEM((c4, n), compute_dtype),   # keys (tied q/k conv)
            pltpu.VMEM((c, n), jnp.float32),      # x_v @ attention accumulator
            pltpu.VMEM((1, n), jnp.float32),      # attention column sums
        ],
        compiler_params=pltpu.CompilerParams(
            dimension_semantics=("parallel", "arbitrary"),
            vmem_limit_bytes=vmem),
    )(x, x, wqk, wv, bv, wt, bt)


# ---------------------------------------------------------------------------
# Plain-JAX glue: furthest point sampling, gathering, kNN grouping.
# Data-dependent index selection (sequential argmax / top-k gather) stays
# outside the Pallas hot path.
# ---------------------------------------------------------------------------
def furthest_point_sample(xyz, npoint):
    """xyz: (B, N, 3) -> (B, npoint) int32 (pointops.furthestsampling)."""
    N = xyz.shape[1]

    def single(pts):
        def body(i, state):
            dists, last, idxs = state
            d = jnp.sum((pts - pts[last]) ** 2, axis=-1)
            dists = jnp.minimum(dists, d)
            nxt = jnp.argmax(dists).astype(jnp.int32)
            return dists, nxt, idxs.at[i].set(nxt)

        dists0 = jnp.full((N,), jnp.inf, jnp.float32)
        idxs0 = jnp.zeros((npoint,), jnp.int32)        # first sample = index 0
        _, _, idxs = jax.lax.fori_loop(1, npoint, body,
                                       (dists0, jnp.int32(0), idxs0))
        return idxs

    return jax.vmap(single)(xyz)


def gather_points(points, idx):
    """points: (B, N, C), idx: (B, ...) int -> gather along N."""
    return jax.vmap(lambda p, i: p[i])(points, idx)


def knn_group(xyz, new_xyz, features, nsample):
    """kNN QueryAndGroup (use_xyz=True), gathered directly channel-first.

    Returns (B, nsample, 3 + C, npoint) — no host-side transpose of the big
    grouped tensor; only the (much smaller) inputs are transposed.
    """
    d2 = jnp.sum((new_xyz[:, :, None, :] - xyz[:, None, :, :]) ** 2, axis=-1)
    _, idx = jax.lax.top_k(-d2, nsample)                  # (B, npoint, nsample)
    idx_sp = jnp.swapaxes(idx, 1, 2)                      # (B, nsample, npoint)

    xyz_cf = jnp.swapaxes(xyz, 1, 2)                      # (B, 3, N)   (small)
    feat_cf = jnp.swapaxes(features, 1, 2)                # (B, C, N)   (small)
    new_xyz_cf = jnp.swapaxes(new_xyz, 1, 2)              # (B, 3, npoint)

    def per_batch(pc, fc, i_sp, nc):
        gx = jax.vmap(lambda i: jnp.take(pc, i, axis=1))(i_sp)   # (ns, 3, np)
        gx = gx - nc[None, :, :]
        gf = jax.vmap(lambda i: jnp.take(fc, i, axis=1))(i_sp)   # (ns, C, np)
        return jnp.concatenate([gx, gf], axis=1)                 # (ns, 3+C, np)

    return jax.vmap(per_batch)(xyz_cf, feat_cf, idx_sp, new_xyz_cf)


# ---------------------------------------------------------------------------
# Parameter preparation (fold eval-mode BatchNorm into conv weights, one time).
# ---------------------------------------------------------------------------
def fold_params(raw, eps=1e-5):
    def bn_fold(gamma, beta, mean, var):
        s = gamma / jnp.sqrt(var + eps)
        return s, beta - mean * s

    s1, sh1 = bn_fold(*raw["bn1"])
    s2, sh2 = bn_fold(*raw["bn2"])
    st, sht = bn_fold(*raw["after_norm"])
    return dict(
        w1=raw["conv1_w"] * s1[:, None], b1=sh1[:, None],
        w2=raw["conv2_w"] * s2[:, None], b2=sh2[:, None],
        wqk=raw["q_conv_w"],
        wv=raw["v_conv_w"], bv=raw["v_conv_b"][:, None],
        wt=raw["trans_conv_w"] * st[:, None],
        bt=(st * raw["trans_conv_b"] + sht)[:, None],
    )


# ---------------------------------------------------------------------------
# Full forward of the SA module (single grouper/mlp/sa branch).
# ---------------------------------------------------------------------------
def pointnet2_sa_forward(xyz, features, params, npoint, nsample, *,
                         compute_dtype=jnp.bfloat16, recip_approx=True):
    """xyz: (B, N, 3) f32; features: (B, N, C) f32.

    Returns (new_xyz: (B, npoint, 3), new_features: (B, C_out, npoint)),
    matching the torch module's output (torch.cat along dim=1, channel-first).
    """
    center_idx = furthest_point_sample(xyz, npoint)            # (B, npoint)
    new_xyz = gather_points(xyz, center_idx)                   # (B, npoint, 3)
    center_features = gather_points(features, center_idx)
    # TODO(synk): the concrete pptnet grouper may consume center_features
    # (e.g. relative features); standard QueryAndGroup(use_xyz=True) does not.
    del center_features

    grouped = knn_group(xyz, new_xyz, features, nsample)       # (B, ns, cin, np)
    pooled = mlp_maxpool(grouped, params["w1"], params["b1"],
                         params["w2"], params["b2"], compute_dtype=compute_dtype)
    g_feat = sa_layer(pooled, params["wqk"], params["wv"], params["bv"],
                      params["wt"], params["bt"],
                      compute_dtype=compute_dtype, recip_approx=recip_approx)
    # single grouper branch -> cat over dim=1 is just this tensor; it is
    # already (B, C_out, npoint), so no trailing transpose.
    return new_xyz, g_feat


# ---------------------------------------------------------------------------
# Pure-jnp references (using the raw, unfolded parameters).
# ---------------------------------------------------------------------------
def _mlp_maxpool_ref(grouped, raw, eps=1e-5):
    g = jnp.transpose(grouped, (0, 2, 1, 3))                   # (B, cin, ns, np)

    def bn(h, stats):
        gm, bt, mn, vr = stats
        s = gm / jnp.sqrt(vr + eps)
        return h * s[None, :, None, None] + (bt - mn * s)[None, :, None, None]

    h = jnp.einsum("oc,bcsp->bosp", raw["conv1_w"], g)
    h = jnp.maximum(bn(h, raw["bn1"]), 0.0)
    h = jnp.einsum("oc,bcsp->bosp", raw["conv2_w"], h)
    h = jnp.maximum(bn(h, raw["bn2"]), 0.0)
    return jnp.max(h, axis=2)                                  # (B, cout, np)


def _sa_ref(x, raw, eps=1e-5):
    q = jnp.einsum("dc,bcn->bdn", raw["q_conv_w"], x)
    energy = jnp.einsum("bdn,bdm->bnm", q, q)
    att = jax.nn.softmax(energy, axis=-1)
    att = att / (1e-9 + jnp.sum(att, axis=1, keepdims=True))
    xv = (jnp.einsum("oc,bcn->bon", raw["v_conv_w"], x)
          + raw["v_conv_b"][None, :, None])
    xr = jnp.einsum("bcn,bnm->bcm", xv, att)
    y = (jnp.einsum("oc,bcn->bon", raw["trans_conv_w"], x - xr)
         + raw["trans_conv_b"][None, :, None])
    g, b, m, v = raw["after_norm"]
    s = g / jnp.sqrt(v + eps)
    y = y * s[None, :, None] + (b - m * s)[None, :, None]
    return x + jnp.maximum(y, 0.0)


if __name__ == "__main__":
    B, N, C = 2, 16, 4            # batch, input points, feature channels
    npoint, nsample = 8, 4
    cin = 3 + C                   # use_xyz=True
    h1, cout = 16, 32             # mlp = [cin, 16, 32]
    c4 = cout // 4

    key = jax.random.PRNGKey(0)
    ks = jax.random.split(key, 12)

    xyz = jax.random.normal(ks[0], (B, N, 3), jnp.float32)
    features = jax.random.normal(ks[1], (B, N, C), jnp.float32)

    def bn_stats(k, c):
        k1, k2, k3, k4 = jax.random.split(k, 4)
        gamma = 1.0 + 0.1 * jax.random.normal(k1, (c,), jnp.float32)
        beta = 0.05 * jax.random.normal(k2, (c,), jnp.float32)
        mean = 0.01 * jax.random.normal(k3, (c,), jnp.float32)
        var = 1.0 + 0.1 * jnp.abs(jax.random.normal(k4, (c,), jnp.float32))
        return gamma, beta, mean, var

    raw = dict(
        conv1_w=0.2 * jax.random.normal(ks[2], (h1, cin), jnp.float32),
        bn1=bn_stats(ks[3], h1),
        conv2_w=0.2 * jax.random.normal(ks[4], (cout, h1), jnp.float32),
        bn2=bn_stats(ks[5], cout),
        q_conv_w=0.2 * jax.random.normal(ks[6], (c4, cout), jnp.float32),
        v_conv_w=0.2 * jax.random.normal(ks[7], (cout, cout), jnp.float32),
        v_conv_b=0.05 * jax.random.normal(ks[8], (cout,), jnp.float32),
        trans_conv_w=0.2 * jax.random.normal(ks[9], (cout, cout), jnp.float32),
        trans_conv_b=0.05 * jax.random.normal(ks[10], (cout,), jnp.float32),
        after_norm=bn_stats(ks[11], cout),
    )
    params = fold_params(raw)

    # Exact mode (f32 MXU operands, exact reciprocal) for a tight check.
    new_xyz, feat_exact = pointnet2_sa_forward(
        xyz, features, params, npoint, nsample,
        compute_dtype=jnp.float32, recip_approx=False)
    # Default performance configuration (bf16 MXU operands, EUP reciprocal).
    _, feat_fast = pointnet2_sa_forward(
        xyz, features, params, npoint, nsample)
    jax.block_until_ready((new_xyz, feat_exact, feat_fast))

    # Pure-jnp reference of the whole hot path (same grouping layout).
    center_idx = furthest_point_sample(xyz, npoint)
    nx = gather_points(xyz, center_idx)
    grouped = knn_group(xyz, nx, features, nsample)            # (B, ns, cin, np)
    pooled_ref = _mlp_maxpool_ref(grouped, raw)
    feat_ref = _sa_ref(pooled_ref, raw)

    assert new_xyz.shape == (B, npoint, 3)
    assert feat_exact.shape == (B, cout, npoint)
    assert feat_fast.shape == (B, cout, npoint)
    assert feat_ref.shape == (B, cout, npoint)

    err_exact = float(jnp.max(jnp.abs(feat_exact - feat_ref)))
    err_fast = float(jnp.max(jnp.abs(feat_fast - feat_ref)))
    assert err_exact < 1e-3, f"exact-mode max abs err {err_exact}"
    # bf16 MXU + approximate EUP reciprocal -> looser sanity bound
    assert err_fast < 2e-1, f"fast-mode max abs err {err_fast}"

    print("KERNEL_OK")
</pallas_src>

<mosaic_0001>
module attributes {stable_mosaic.version = 11 : i64} {
  func.func @_mlp_maxpool_kernel(%arg0: i32, %arg1: i32, %arg2: memref<1x4x7x8xf32, #tpu.memory_space<vmem>>, %arg3: memref<16x7xf32, #tpu.memory_space<vmem>>, %arg4: memref<16x1xf32, #tpu.memory_space<vmem>>, %arg5: memref<32x16xf32, #tpu.memory_space<vmem>>, %arg6: memref<32x1xf32, #tpu.memory_space<vmem>>, %arg7: memref<1x32x8xf32, #tpu.memory_space<vmem>>) attributes {dimension_semantics = [#tpu.dimension_semantics<parallel>, #tpu.dimension_semantics<parallel>], iteration_bounds = array<i64: 2, 1>, scalar_prefetch = 0 : i64, scratch_operands = 0 : i64, tpu.core_type = #tpu.core_type<tc>, window_params = [{transform_indices = @transform_0, window_bounds = array<i64: 1, 4, 7, 8>}, {pipeline_mode = #tpu.pipeline_mode<synchronous>, transform_indices = @transform_1, window_bounds = array<i64: 16, 7>}, {pipeline_mode = #tpu.pipeline_mode<synchronous>, transform_indices = @transform_2, window_bounds = array<i64: 16, 1>}, {pipeline_mode = #tpu.pipeline_mode<synchronous>, transform_indices = @transform_3, window_bounds = array<i64: 32, 16>}, {pipeline_mode = #tpu.pipeline_mode<synchronous>, transform_indices = @transform_4, window_bounds = array<i64: 32, 1>}, {transform_indices = @transform_5, window_bounds = array<i64: 1, 32, 8>}]} {
    %c0 = arith.constant 0 : index
    %c0_0 = arith.constant 0 : index
    %c0_1 = arith.constant 0 : index
    %c0_2 = arith.constant 0 : index
    %0 = vector.load %arg2[%c0, %c0_0, %c0_1, %c0_2] : memref<1x4x7x8xf32, #tpu.memory_space<vmem>>, vector<1x1x7x8xf32>
    %1 = vector.shape_cast %0 : vector<1x1x7x8xf32> to vector<7x8xf32>
    %c0_3 = arith.constant 0 : index
    %c0_4 = arith.constant 0 : index
    %2 = vector.load %arg3[%c0_3, %c0_4] : memref<16x7xf32, #tpu.memory_space<vmem>>, vector<16x7xf32>
    %cst = arith.constant dense<0.000000e+00> : vector<16x8xf32>
    %3 = tpu.matmul %2, %1, %cst {dimension_numbers = #tpu.dot_dimension_numbers<[1], [0], [0], [1], [0, 0, 1, 1], [], []>} : vector<16x7xf32>, vector<7x8xf32>, vector<16x8xf32> -> vector<16x8xf32>
    %c0_5 = arith.constant 0 : index
    %c0_6 = arith.constant 0 : index
    %4 = vector.load %arg4[%c0_5, %c0_6] : memref<16x1xf32, #tpu.memory_space<vmem>>, vector<16x1xf32>
    %5 = vector.broadcast %4 : vector<16x1xf32> to vector<16x8xf32>
    %6 = arith.addf %3, %5 : vector<16x8xf32>
    %cst_7 = arith.constant 0.000000e+00 : f32
    %7 = vector.broadcast %cst_7 : f32 to vector<16x8xf32>
    %8 = arith.maximumf %6, %7 : vector<16x8xf32>
    %c0_8 = arith.constant 0 : index
    %c0_9 = arith.constant 0 : index
    %9 = vector.load %arg5[%c0_8, %c0_9] : memref<32x16xf32, #tpu.memory_space<vmem>>, vector<32x16xf32>
    %cst_10 = arith.constant dense<0.000000e+00> : vector<32x8xf32>
    %10 = tpu.matmul %9, %8, %cst_10 {dimension_numbers = #tpu.dot_dimension_numbers<[1], [0], [0], [1], [0, 0, 1, 1], [], []>} : vector<32x16xf32>, vector<16x8xf32>, vector<32x8xf32> -> vector<32x8xf32>
    %c0_11 = arith.constant 0 : index
    %c0_12 = arith.constant 0 : index
    %11 = vector.load %arg6[%c0_11, %c0_12] : memref<32x1xf32, #tpu.memory_space<vmem>>, vector<32x1xf32>
    %12 = vector.broadcast %11 : vector<32x1xf32> to vector<32x8xf32>
    %13 = arith.addf %10, %12 : vector<32x8xf32>
    %cst_13 = arith.constant 0.000000e+00 : f32
    %14 = vector.broadcast %cst_13 : f32 to vector<32x8xf32>
    %15 = arith.maximumf %13, %14 : vector<32x8xf32>
    %c0_14 = arith.constant 0 : index
    %c1 = arith.constant 1 : index
    %c0_15 = arith.constant 0 : index
    %c0_16 = arith.constant 0 : index
    %16 = vector.load %arg2[%c0_14, %c1, %c0_15, %c0_16] : memref<1x4x7x8xf32, #tpu.memory_space<vmem>>, vector<1x1x7x8xf32>
    %17 = vector.shape_cast %16 : vector<1x1x7x8xf32> to vector<7x8xf32>
    %c0_17 = arith.constant 0 : index
    %c0_18 = arith.constant 0 : index
    %18 = vector.load %arg3[%c0_17, %c0_18] : memref<16x7xf32, #tpu.memory_space<vmem>>, vector<16x7xf32>
    %cst_19 = arith.constant dense<0.000000e+00> : vector<16x8xf32>
    %19 = tpu.matmul %18, %17, %cst_19 {dimension_numbers = #tpu.dot_dimension_numbers<[1], [0], [0], [1], [0, 0, 1, 1], [], []>} : vector<16x7xf32>, vector<7x8xf32>, vector<16x8xf32> -> vector<16x8xf32>
    %c0_20 = arith.constant 0 : index
    %c0_21 = arith.constant 0 : index
    %20 = vector.load %arg4[%c0_20, %c0_21] : memref<16x1xf32, #tpu.memory_space<vmem>>, vector<16x1xf32>
    %21 = vector.broadcast %20 : vector<16x1xf32> to vector<16x8xf32>
    %22 = arith.addf %19, %21 : vector<16x8xf32>
    %cst_22 = arith.constant 0.000000e+00 : f32
    %23 = vector.broadcast %cst_22 : f32 to vector<16x8xf32>
    %24 = arith.maximumf %22, %23 : vector<16x8xf32>
    %c0_23 = arith.constant 0 : index
    %c0_24 = arith.constant 0 : index
    %25 = vector.load %arg5[%c0_23, %c0_24] : memref<32x16xf32, #tpu.memory_space<vmem>>, vector<32x16xf32>
    %cst_25 = arith.constant dense<0.000000e+00> : vector<32x8xf32>
    %26 = tpu.matmul %25, %24, %cst_25 {dimension_numbers = #tpu.dot_dimension_numbers<[1], [0], [0], [1], [0, 0, 1, 1], [], []>} : vector<32x16xf32>, vector<16x8xf32>, vector<32x8xf32> -> vector<32x8xf32>
    %c0_26 = arith.constant 0 : index
    %c0_27 = arith.constant 0 : index
    %27 = vector.load %arg6[%c0_26, %c0_27] : memref<32x1xf32, #tpu.memory_space<vmem>>, vector<32x1xf32>
    %28 = vector.broadcast %27 : vector<32x1xf32> to vector<32x8xf32>
    %29 = arith.addf %26, %28 : vector<32x8xf32>
    %cst_28 = arith.constant 0.000000e+00 : f32
    %30 = vector.broadcast %cst_28 : f32 to vector<32x8xf32>
    %31 = arith.maximumf %29, %30 : vector<32x8xf32>
    %32 = arith.maximumf %15, %31 : vector<32x8xf32>
    %c0_29 = arith.constant 0 : index
    %c2 = arith.constant 2 : index
    %c0_30 = arith.constant 0 : index
    %c0_31 = arith.constant 0 : index
    %33 = vector.load %arg2[%c0_29, %c2, %c0_30, %c0_31] : memref<1x4x7x8xf32, #tpu.memory_space<vmem>>, vector<1x1x7x8xf32>
    %34 = vector.shape_cast %33 : vector<1x1x7x8xf32> to vector<7x8xf32>
    %c0_32 = arith.constant 0 : index
    %c0_33 = arith.constant 0 : index
    %35 = vector.load %arg3[%c0_32, %c0_33] : memref<16x7xf32, #tpu.memory_space<vmem>>, vector<16x7xf32>
    %cst_34 = arith.constant dense<0.000000e+00> : vector<16x8xf32>
    %36 = tpu.matmul %35, %34, %cst_34 {dimension_numbers = #tpu.dot_dimension_numbers<[1], [0], [0], [1], [0, 0, 1, 1], [], []>} : vector<16x7xf32>, vector<7x8xf32>, vector<16x8xf32> -> vector<16x8xf32>
    %c0_35 = arith.constant 0 : index
    %c0_36 = arith.constant 0 : index
    %37 = vector.load %arg4[%c0_35, %c0_36] : memref<16x1xf32, #tpu.memory_space<vmem>>, vector<16x1xf32>
    %38 = vector.broadcast %37 : vector<16x1xf32> to vector<16x8xf32>
    %39 = arith.addf %36, %38 : vector<16x8xf32>
    %cst_37 = arith.constant 0.000000e+00 : f32
    %40 = vector.broadcast %cst_37 : f32 to vector<16x8xf32>
    %41 = arith.maximumf %39, %40 : vector<16x8xf32>
    %c0_38 = arith.constant 0 : index
    %c0_39 = arith.constant 0 : index
    %42 = vector.load %arg5[%c0_38, %c0_39] : memref<32x16xf32, #tpu.memory_space<vmem>>, vector<32x16xf32>
    %cst_40 = arith.constant dense<0.000000e+00> : vector<32x8xf32>
    %43 = tpu.matmul %42, %41, %cst_40 {dimension_numbers = #tpu.dot_dimension_numbers<[1], [0], [0], [1], [0, 0, 1, 1], [], []>} : vector<32x16xf32>, vector<16x8xf32>, vector<32x8xf32> -> vector<32x8xf32>
    %c0_41 = arith.constant 0 : index
    %c0_42 = arith.constant 0 : index
    %44 = vector.load %arg6[%c0_41, %c0_42] : memref<32x1xf32, #tpu.memory_space<vmem>>, vector<32x1xf32>
    %45 = vector.broadcast %44 : vector<32x1xf32> to vector<32x8xf32>
    %46 = arith.addf %43, %45 : vector<32x8xf32>
    %cst_43 = arith.constant 0.000000e+00 : f32
    %47 = vector.broadcast %cst_43 : f32 to vector<32x8xf32>
    %48 = arith.maximumf %46, %47 : vector<32x8xf32>
    %49 = arith.maximumf %32, %48 : vector<32x8xf32>
    %c0_44 = arith.constant 0 : index
    %c3 = arith.constant 3 : index
    %c0_45 = arith.constant 0 : index
    %c0_46 = arith.constant 0 : index
    %50 = vector.load %arg2[%c0_44, %c3, %c0_45, %c0_46] : memref<1x4x7x8xf32, #tpu.memory_space<vmem>>, vector<1x1x7x8xf32>
    %51 = vector.shape_cast %50 : vector<1x1x7x8xf32> to vector<7x8xf32>
    %c0_47 = arith.constant 0 : index
    %c0_48 = arith.constant 0 : index
    %52 = vector.load %arg3[%c0_47, %c0_48] : memref<16x7xf32, #tpu.memory_space<vmem>>, vector<16x7xf32>
    %cst_49 = arith.constant dense<0.000000e+00> : vector<16x8xf32>
    %53 = tpu.matmul %52, %51, %cst_49 {dimension_numbers = #tpu.dot_dimension_numbers<[1], [0], [0], [1], [0, 0, 1, 1], [], []>} : vector<16x7xf32>, vector<7x8xf32>, vector<16x8xf32> -> vector<16x8xf32>
    %c0_50 = arith.constant 0 : index
    %c0_51 = arith.constant 0 : index
    %54 = vector.load %arg4[%c0_50, %c0_51] : memref<16x1xf32, #tpu.memory_space<vmem>>, vector<16x1xf32>
    %55 = vector.broadcast %54 : vector<16x1xf32> to vector<16x8xf32>
    %56 = arith.addf %53, %55 : vector<16x8xf32>
    %cst_52 = arith.constant 0.000000e+00 : f32
    %57 = vector.broadcast %cst_52 : f32 to vector<16x8xf32>
    %58 = arith.maximumf %56, %57 : vector<16x8xf32>
    %c0_53 = arith.constant 0 : index
    %c0_54 = arith.constant 0 : index
    %59 = vector.load %arg5[%c0_53, %c0_54] : memref<32x16xf32, #tpu.memory_space<vmem>>, vector<32x16xf32>
    %cst_55 = arith.constant dense<0.000000e+00> : vector<32x8xf32>
    %60 = tpu.matmul %59, %58, %cst_55 {dimension_numbers = #tpu.dot_dimension_numbers<[1], [0], [0], [1], [0, 0, 1, 1], [], []>} : vector<32x16xf32>, vector<16x8xf32>, vector<32x8xf32> -> vector<32x8xf32>
    %c0_56 = arith.constant 0 : index
    %c0_57 = arith.constant 0 : index
    %61 = vector.load %arg6[%c0_56, %c0_57] : memref<32x1xf32, #tpu.memory_space<vmem>>, vector<32x1xf32>
    %62 = vector.broadcast %61 : vector<32x1xf32> to vector<32x8xf32>
    %63 = arith.addf %60, %62 : vector<32x8xf32>
    %cst_58 = arith.constant 0.000000e+00 : f32
    %64 = vector.broadcast %cst_58 : f32 to vector<32x8xf32>
    %65 = arith.maximumf %63, %64 : vector<32x8xf32>
    %66 = arith.maximumf %49, %65 : vector<32x8xf32>
    %c0_59 = arith.constant 0 : index
    %c0_60 = arith.constant 0 : index
    %c0_61 = arith.constant 0 : index
    %67 = vector.load %arg7[%c0_59, %c0_60, %c0_61] : memref<1x32x8xf32, #tpu.memory_space<vmem>>, vector<1x32x8xf32>
    %68 = vector.shape_cast %67 : vector<1x32x8xf32> to vector<32x8xf32>
    %69 = vector.shape_cast %66 : vector<32x8xf32> to vector<1x32x8xf32>
    tpu.vector_store %arg7[%c0_59, %c0_60, %c0_61], %69 {strides = array<i32>} : memref<1x32x8xf32, #tpu.memory_space<vmem>>, vector<1x32x8xf32>,
    return
  }
  func.func @transform_0(%arg0: i32, %arg1: i32) -> (i32, i32, i32, i32) {
    %c0_i32 = arith.constant 0 : i32
    %c0_i32_0 = arith.constant 0 : i32
    %c0_i32_1 = arith.constant 0 : i32
    return %arg0, %c0_i32, %c0_i32_0, %arg1 : i32, i32, i32, i32
  }
  func.func @transform_1(%arg0: i32, %arg1: i32) -> (i32, i32) {
    %c0_i32 = arith.constant 0 : i32
    %c0_i32_0 = arith.constant 0 : i32
    %c0_i32_1 = arith.constant 0 : i32
    return %c0_i32, %c0_i32_0 : i32, i32
  }
  func.func @transform_2(%arg0: i32, %arg1: i32) -> (i32, i32) {
    %c0_i32 = arith.constant 0 : i32
    %c0_i32_0 = arith.constant 0 : i32
    %c0_i32_1 = arith.constant 0 : i32
    return %c0_i32, %c0_i32_0 : i32, i32
  }
  func.func @transform_3(%arg0: i32, %arg1: i32) -> (i32, i32) {
    %c0_i32 = arith.constant 0 : i32
    %c0_i32_0 = arith.constant 0 : i32
    %c0_i32_1 = arith.constant 0 : i32
    return %c0_i32, %c0_i32_0 : i32, i32
  }
  func.func @transform_4(%arg0: i32, %arg1: i32) -> (i32, i32) {
    %c0_i32 = arith.constant 0 : i32
    %c0_i32_0 = arith.constant 0 : i32
    %c0_i32_1 = arith.constant 0 : i32
    return %c0_i32, %c0_i32_0 : i32, i32
  }
  func.func @transform_5(%arg0: i32, %arg1: i32) -> (i32, i32, i32) {
    %c0_i32 = arith.constant 0 : i32
    %c0_i32_0 = arith.constant 0 : i32
    return %arg0, %c0_i32, %arg1 : i32, i32, i32
  }
}

</mosaic_0001>

<bundles_post_ra>
// kernel: tpu_custom_call.1
= control target key start
LH: loop header
LB: loop body
LE: loop exit
PB: predicated region body
PF: predicated region fallthrough
CT: control target
= control target key end

     0   :  { %s1324_s18 = smov 0   ;;  %s1326_s19 = smov 0   ;;  %s1496_s0 = inlined_call_operand.vmem [shape: f32[2,4,7,8], index: 0, kind: input, shape index: {}]   ;;  %s1497_s1 = inlined_call_operand.vmem [shape: f32[16,7], index: 1, kind: input, shape index: {}]   ;;  %s1498_s2 = inlined_call_operand.vmem [shape: f32[16,1], index: 2, kind: input, shape index: {}]   ;;  %s1499_s3 = inlined_call_operand.vmem [shape: f32[32,16], index: 3, kind: input, shape index: {}]   ;;  %s1500_s4 = inlined_call_operand.vmem [shape: f32[32,1], index: 4, kind: input, shape index: {}]   ;;  %s1501_s5 = inlined_call_operand.vmem [shape: f32[2,32,8], index: 5, kind: output, shape index: {}]  }
   0x1   :  { %s1328_s20 = smov 0  }
   0x2 LB: > { %s27_s21 = sadd.s32 1, %s1287_s19  ;;  %p1106_p0 = scmp.ge.s32.totalorder %s1291_s20, 1  ;;  %s1291_s20 = sphi %s1328_s20, %s15_s20   ;;  %s1287_s19 = sphi %s1326_s19, %s1503_s19   ;;  %s1283_s18 = sphi %s1324_s18, %s1502_s18  }
   0x3   : > { %p29_p1 = scmp.ge.s32.totalorder %s27_s21, 2  ;;  %p206_p2 = scmp.lt.s32.totalorder %s1291_s20, 3 }
   0x5   : > { %s1505_s21 = smov (%p29_p1, %s27_s21), 0  ;;  %p207_p3 = pnand %p1106_p0, %p206_p2 }
   0x6   : > { %p240_p4 = scmp.lt.s32.totalorder (!%p207_p3), %s1283_s18, 1 }
   0x7   : > { %210 = sbr.rel (%p207_p3) target bundleno = 636 (0x27c), region = 40 }
   0xc   : > { %v1345_v0 = vld [vmem:[%s1497_s1] sm:$0xff]  ;;  %vm271_vm0 = vcmask 56320   ;;  %v260_v1 = vld [vmem:[%s1498_s2 + $0x8] sm:$0xff]  ;;  %s1507_s18 = smov (!%p240_p4, %s1283_s18), 1  ;;  %v1293_v2 = vmov 0   ;;  %vm278_vm1 = vcmask 1046528  }
   0xd   : > { %1184 = vmatprep.mubr.msk.f32.mxu1 %vm271_vm0, %v1345_v0  ;;  %1199 = vmatprep.mubr.msk.f32.mxu0 %vm271_vm0, %v1345_v0  ;;  %s1144_s26 = sshll.u32 %s1507_s18, 5  ;;  %v258_v5 = vld [vmem:[%s1497_s1 + $0x8] sm:$0xff]  ;;  %v259_v6 = vld [vmem:[%s1498_s2] sm:$0xff]  ;;  %v365_v7 = vld [vmem:[%s1500_s4 + $0x10] sm:$0xff]  ;;  %vm387_vm2 = vcmask 130048   ;;  %vm1014_vm3 = vcmask 64512  }
   0xe   : > { %1267 = vset.pattern.permute.xlu0 %v1293_v2  ;;  %1268 = vset.pattern.permute.xlu1 %v1293_v2  ;;  %s1362_s29 = scalar_lea.vmem %s1496_s0, %s1144_s26  ;;  %v359_v8 = vld [vmem:[%s1499_s3] sm:$0xff]  ;;  %v364_v10 = vld [vmem:[%s1500_s4 + $0x8] sm:$0xff]  ;;  %v366_v11 = vld [vmem:[%s1500_s4 + $0x18] sm:$0xff]  ;;  %s255_s7 = scalar_lea.vmem %s1501_s5, %s1144_s26 }
   0xf   : > { %268 = vperm.xlu0 %1267, %v260_v1   ;;  %v256_v3 = vld [vmem:[%s1362_s29] sm:$0x7f]  ;;  %v1118_v4 = vld [vmem:[%s1362_s29 + $0x8] sm:$0x7f]  ;;  %v1126_v27 = vld [vmem:[%s1362_s29 + $0x10] sm:$0x7f] }
  0x10   : > { %1182 = vmatprep.subr.msk.mxu1 %vm278_vm1, %v256_v3  ;;  %1197 = vmatprep.subr.msk.mxu0 %vm278_vm1, %v1118_v4  ;;  %v363_v9 = vld [vmem:[%s1500_s4] sm:$0xff]  ;;  %v1406_v26 = vld [vmem:[%s1499_s3 + $0x8] sm:$0xff]  ;;  %v1134_v28 = vld [vmem:[%s1362_s29 + $0x18] sm:$0x7f] }
  0x11   : > { %1183 = vmatpush3.msk.msra.mxu1 %vm278_vm1, %v256_v3  ;;  %1198 = vmatpush3.msk.msra.mxu0 %vm278_vm1, %v1118_v4  ;;  %v1413_v29 = vld [vmem:[%s1499_s3 + $0x10] sm:$0xff]  ;;  %v1424_v30 = vld [vmem:[%s1499_s3 + $0x18] sm:$0xff] }
  0x12   : > { %1185 = vmatmul.mubr.msk.f32.vlgmr.msra.gmra.mxu1 %vm271_vm0, %v258_v5  ;;  %1200 = vmatmul.mubr.msk.f32.vlgmr.msra.gmra.mxu0 %vm271_vm0, %v258_v5 }
  0x13   : > { %263 = vperm.xlu0 %1267, %v259_v6   ;;  %1191 = vmatprep.mubr.msk.f32.mxu1 %vm387_vm2, %v359_v8 }
  0x14   : > { %1206 = vmatprep.mubr.msk.f32.mxu0 %vm387_vm2, %v359_v8  ;;  %369 = vperm.xlu1 %1268, %v363_v9  }
  0x17   : > { %379 = vperm.xlu0 %1267, %v365_v7  }
  0x18   : > { %374 = vperm.xlu1 %1268, %v364_v10  }
  0x1c   : > { %384 = vperm.xlu1 %1268, %v366_v11  }
  0x8a   : > { %v1395_v12 = vpop.permute.xlu0 %268 }
  0x8e   : > { %v1397_v15 = vpop.permute.xlu0 %263 }
  0x8f   : > { %v1444_v31 = vpop.permute.xlu1 %369 }
  0x92   : > { %v1450_v46 = vpop.permute.xlu0 %379 }
  0x93   : > { %v375_v32 = vpop.permute.xlu1 %374 }
  0x97   : > { %v1446_v37 = vpop.permute.xlu1 %384 }
  0xd2   : > { %v1186_v13 = vpop.f32.mrf.mxu1  ;;  %v1201_v14 = vpop.f32.mrf.mxu0 }
  0xd3   : > { %v354_v16 = vadd.f32 %v1186_v13, %v1395_v12  ;;  %v566_v17 = vadd.f32 %v1201_v14, %v1395_v12 }
  0xd4   : > { %v348_v18 = vpop.f32.mrf.mxu1  ;;  %v560_v19 = vpop.f32.mrf.mxu0 }
  0xd5   : > { %v358_v20 = vmax.f32 %v354_v16, 0.0  ;;  %v570_v21 = vmax.f32 %v566_v17, 0.0  ;;  %v349_v22 = vadd.f32 %v348_v18, %v1397_v15  ;;  %v561_v23 = vadd.f32 %v560_v19, %v1397_v15 }
  0xd7   : > { %v357_v24 = vmax.f32 %v349_v22, 0.0  ;;  %v569_v25 = vmax.f32 %v561_v23, 0.0  ;;  %1187 = vmatprep.subr.mxu1 %v358_v20  ;;  %1202 = vmatprep.subr.mxu0 %v570_v21 }
  0xd8   : > { %1188 = vmatpush3.msra.mxu1 %v358_v20  ;;  %1203 = vmatpush3.msra.mxu0 %v570_v21 }
  0xd9   : > { %1189 = vmatprep.subr.mxu1 %v357_v24  ;;  %1204 = vmatprep.subr.mxu0 %v569_v25 }
  0xda   : > { %1190 = vmatpush3.msra.mxu1 %v357_v24  ;;  %1205 = vmatpush3.msra.mxu0 %v569_v25 }
  0xdb   : > { %1192 = vmatmul.mubr.msk.f32.vlgmr.msra.gmra.mxu1 %vm387_vm2, %v1406_v26  ;;  %1207 = vmatmul.mubr.msk.f32.vlgmr.msra.gmra.mxu0 %vm387_vm2, %v1406_v26 }
  0xdc   : > { %1212 = vmatprep.subr.msk.mxu1 %vm278_vm1, %v1126_v27  ;;  %1227 = vmatprep.subr.msk.mxu0 %vm278_vm1, %v1134_v28 }
  0xdd   : > { %1213 = vmatpush3.msk.msra.mxu1 %vm278_vm1, %v1126_v27  ;;  %1194 = vmatprep.mubr.msk.f32.mxu1 %vm387_vm2, %v1413_v29 }
  0xde   : > { %1209 = vmatprep.mubr.msk.f32.mxu0 %vm387_vm2, %v1413_v29  ;;  %1228 = vmatpush3.msk.msra.mxu0 %vm278_vm1, %v1134_v28 }
  0xdf   : > { %1195 = vmatmul.mubr.msk.f32.gmra.mxu1 %vm387_vm2, %v1424_v30  ;;  %1210 = vmatmul.mubr.msk.f32.gmra.mxu0 %vm387_vm2, %v1424_v30 }
  0xe0   : > { %1214 = vmatprep.mubr.msk.f32.mxu1 %vm271_vm0, %v1345_v0  ;;  %1229 = vmatprep.mubr.msk.f32.mxu0 %vm271_vm0, %v1345_v0 }
  0xe3   : > { %1215 = vmatmul.mubr.msk.f32.vlgmr.msra.gmra.mxu1 %vm271_vm0, %v258_v5  ;;  %1230 = vmatmul.mubr.msk.f32.vlgmr.msra.gmra.mxu0 %vm271_vm0, %v258_v5 }
  0xe4   : > { %1221 = vmatprep.mubr.msk.f32.mxu1 %vm387_vm2, %v359_v8  ;;  %1236 = vmatprep.mubr.msk.f32.mxu0 %vm387_vm2, %v359_v8 }
 0x19b   : > { %v1193_v33 = vpop.f32.mrf.mxu1  ;;  %v1208_v34 = vpop.f32.mrf.mxu0 }
 0x19c   : > { %v472_v35 = vadd.f32 %v1193_v33, %v375_v32  ;;  %v643_v36 = vadd.f32 %v1208_v34, %v375_v32 }
 0x19d   : > { %v466_v38 = vpop.f32.mrf.mxu1  ;;  %v637_v39 = vpop.f32.mrf.mxu0 }
 0x19e   : > { %v486_v40 = vmax.f32 %v472_v35, 0.0  ;;  %v657_v41 = vmax.f32 %v643_v36, 0.0  ;;  %v467_v42 = vadd.f32 %v466_v38, %v1444_v31  ;;  %v638_v43 = vadd.f32 %v637_v39, %v1444_v31 }
 0x19f   : > { %v1196_v44 = vpop.f32.mrf.mxu1  ;;  %v1211_v45 = vpop.f32.mrf.mxu0 }
 0x1a0   : > { %v661_v47 = vmax.f32 %v486_v40, %v657_v41  ;;  %v485_v48 = vmax.f32 %v467_v42, 0.0  ;;  %v656_v49 = vmax.f32 %v638_v43, 0.0  ;;  %v482_v50 = vadd.f32 %v1196_v44, %v1446_v37 }
 0x1a1   : > { %v653_v51 = vadd.f32 %v1211_v45, %v1446_v37  ;;  %v476_v52 = vpop.f32.mrf.mxu1  ;;  %v647_v53 = vpop.f32.mrf.mxu0 }
 0x1a2   : > { %v660_v54 = vmax.f32 %v485_v48, %v656_v49  ;;  %v488_v55 = vmax.f32 %v482_v50, 0.0  ;;  %v477_v56 = vadd.f32 %v476_v52, %v1450_v46  ;;  %v648_v57 = vadd.f32 %v647_v53, %v1450_v46 }
 0x1a3   : > { %v659_v58 = vmax.f32 %v653_v51, 0.0  ;;  %v1216_v59 = vpop.f32.mrf.mxu1  ;;  %v1231_v60 = vpop.f32.mrf.mxu0 }
 0x1a4   : > { %v487_v61 = vmax.f32 %v477_v56, 0.0  ;;  %v658_v62 = vmax.f32 %v648_v57, 0.0  ;;  %v741_v63 = vadd.f32 %v1216_v59, %v1395_v12  ;;  %v916_v0 = vadd.f32 %v1231_v60, %v1395_v12 }
 0x1a5   : > { %v663_v1 = vmax.f32 %v488_v55, %v659_v58  ;;  %v735_v2 = vpop.f32.mrf.mxu1  ;;  %v910_v3 = vpop.f32.mrf.mxu0 }
 0x1a6   : > { %v662_v4 = vmax.f32 %v487_v61, %v658_v62  ;;  %v745_v5 = vmax.f32 %v741_v63, 0.0  ;;  %v920_v6 = vmax.f32 %v916_v0, 0.0  ;;  %v736_v7 = vadd.f32 %v735_v2, %v1397_v15 }
 0x1a7   : > { %v911_v8 = vadd.f32 %v910_v3, %v1397_v15 }
 0x1a8   : > { %v744_v9 = vmax.f32 %v736_v7, 0.0  ;;  %1217 = vmatprep.subr.mxu1 %v745_v5  ;;  %1232 = vmatprep.subr.mxu0 %v920_v6 }
 0x1a9   : > { %v919_v10 = vmax.f32 %v911_v8, 0.0  ;;  %1218 = vmatpush3.msra.mxu1 %v745_v5  ;;  %1233 = vmatpush3.msra.mxu0 %v920_v6 }
 0x1aa   : > { %1219 = vmatprep.subr.mxu1 %v744_v9 }
 0x1ab   : > { %1234 = vmatprep.subr.mxu0 %v919_v10  ;;  %1220 = vmatpush3.msra.mxu1 %v744_v9 }
 0x1ac   : > { %1235 = vmatpush3.msra.mxu0 %v919_v10  ;;  %1222 = vmatmul.mubr.msk.f32.vlgmr.msra.gmra.mxu1 %vm387_vm2, %v1406_v26 }
 0x1ad   : > { %1237 = vmatmul.mubr.msk.f32.vlgmr.msra.gmra.mxu0 %vm387_vm2, %v1406_v26  ;;  %1224 = vmatprep.mubr.msk.f32.mxu1 %vm387_vm2, %v1413_v29 }
 0x1ae   : > { %1239 = vmatprep.mubr.msk.f32.mxu0 %vm387_vm2, %v1413_v29 }
 0x1b0   : > { %1225 = vmatmul.mubr.msk.f32.gmra.mxu1 %vm387_vm2, %v1424_v30 }
 0x1b1   : > { %1240 = vmatmul.mubr.msk.f32.gmra.mxu0 %vm387_vm2, %v1424_v30 }
 0x26c   : > { %v1223_v11 = vpop.f32.mrf.mxu1 }
 0x26d   : > { %v818_v12 = vadd.f32 %v1223_v11, %v375_v32  ;;  %v1238_v13 = vpop.f32.mrf.mxu0 }
 0x26e   : > { %v993_v14 = vadd.f32 %v1238_v13, %v375_v32  ;;  %v812_v15 = vpop.f32.mrf.mxu1 }
 0x26f   : > { %v832_v16 = vmax.f32 %v818_v12, 0.0  ;;  %v813_v17 = vadd.f32 %v812_v15, %v1444_v31  ;;  %v987_v18 = vpop.f32.mrf.mxu0 }
 0x270   : > { %v988_v19 = vadd.f32 %v987_v18, %v1444_v31  ;;  %v1226_v20 = vpop.f32.mrf.mxu1  ;;  %v1007_v22 = vmax.f32 %v993_v14, 0.0 }
 0x271   : > { %v836_v21 = vmax.f32 %v661_v47, %v832_v16  ;;  %v831_v23 = vmax.f32 %v813_v17, 0.0  ;;  %v828_v24 = vadd.f32 %v1226_v20, %v1446_v37  ;;  %v1241_v25 = vpop.f32.mrf.mxu0 }
 0x272   : > { %v1006_v26 = vmax.f32 %v988_v19, 0.0  ;;  %v1003_v27 = vadd.f32 %v1241_v25, %v1446_v37  ;;  %v822_v28 = vpop.f32.mrf.mxu1 }
 0x273   : > { %v1011_v29 = vmax.f32 %v836_v21, %v1007_v22  ;;  %v835_v30 = vmax.f32 %v660_v54, %v831_v23  ;;  %v834_v31 = vmax.f32 %v828_v24, 0.0  ;;  %v823_v32 = vadd.f32 %v822_v28, %v1450_v46  ;;  %v997_v33 = vpop.f32.mrf.mxu0 }
 0x274   : > { %v998_v34 = vadd.f32 %v997_v33, %v1450_v46  ;;  %v1009_v38 = vmax.f32 %v1003_v27, 0.0 }
 0x275   : > { %1016 = vst.msk [vmem:[%s255_s7 + $0x8] sm:$0xff] %vm1014_vm3, %v1011_v29  ;;  %v1010_v35 = vmax.f32 %v835_v30, %v1006_v26  ;;  %v838_v36 = vmax.f32 %v663_v1, %v834_v31  ;;  %v833_v39 = vmax.f32 %v823_v32, 0.0 }
 0x276   : > { %v1008_v37 = vmax.f32 %v998_v34, 0.0 }
 0x277   : > { %1015 = vst.msk [vmem:[%s255_s7] sm:$0xff] %vm1014_vm3, %v1010_v35  ;;  %v1013_v40 = vmax.f32 %v838_v36, %v1009_v38  ;;  %v837_v41 = vmax.f32 %v662_v4, %v833_v39 }
 0x279   : > { %1018 = vst.msk [vmem:[%s255_s7 + $0x18] sm:$0xff] %vm1014_vm3, %v1013_v40  ;;  %v1012_v42 = vmax.f32 %v837_v41, %v1008_v37 }
 0x27b   : > { %1017 = vst.msk [vmem:[%s255_s7 + $0x10] sm:$0xff] %vm1014_vm3, %v1012_v42 }
 0x27c PF: > { %s15_s20 = sadd.s32 1, %s1291_s20   ;;  %s1502_s18 = smov %s1287_s19 }
 0x27d   : > { %p12_p5 = scmp.ge.s32.totalorder %s15_s20, 4   ;;  %s1503_s19 = smov %s1505_s21 }
 0x27f   :  { %14 = sbr.rel (!%p12_p5) target bundleno = 2 (0x2), region = 73 }

</bundles_post_ra>
